<compile_context>
chip_gen: v6e
topology: v6e:2x2x1
jax: 0.10.0
libtpu: 0.0.40
codegen_flags: <defaults>
</compile_context>

<pallas_src>
import functools

import jax
import jax.numpy as jnp
from jax import lax
from jax.experimental import pallas as pl
from jax.experimental.pallas import tpu as pltpu

_LANE = 128


def _cdiv(a, b):
    return (a + b - 1) // b


def _round_up(x, m):
    return _cdiv(x, m) * m


def _tpu_budget():
    """Generation-aware (vmem_limit_bytes, num_tensorcores)."""
    phys = 64 * 1024 * 1024  # conservative fallback (v7x per-TC VMEM)
    cores = 1
    try:
        info = pltpu.get_tpu_info()
        phys = int(info.vmem_capacity_bytes)
        for name in ("num_cores", "num_tensorcores", "tensorcore_count", "core_count"):
            v = getattr(info, name, None)
            if isinstance(v, int) and v > 0:
                cores = v
                break
    except Exception:
        pass
    # ~102 MiB on v5e/v6e (128 MiB physical), ~51 MiB on v7x (64 MiB physical).
    return int(phys * 0.8), cores


def _choose_tiling(hw, n_pad, vmem_limit, feat_bytes, want_split):
    """Pick the contraction tile TK (multiple of 128, divides hw_pad), the
    padded HW, the number of K steps and the TC split factor, sized so that
    2x double-buffered (n_pad, TK) feature tiles + the resident gram buffers
    fit the generation's VMEM limit."""
    a = _cdiv(hw, _LANE)                          # HW in 128-lane units
    resident = 2 * n_pad * n_pad * 4              # double-buffered f32 gram out
    slack = 2 << 20                               # mask tiles, internal scratch
    budget = vmem_limit - resident - slack
    per_lane_blk = 2 * (n_pad + 1) * feat_bytes * _LANE   # feats + mask, x2 bufs
    b = max(1, budget // per_lane_blk) if budget > 0 else 1
    b = min(b, a)                                 # TK cannot exceed padded HW
    s = _cdiv(a, b)                               # number of K grid steps
    # Split the K reduction over TensorCores only when it can actually help
    # (multiple cores, enough steps, large enough gram to be MXU-bound).
    n_split = want_split if (want_split > 1 and s >= 2 * want_split
                             and n_pad >= 256) else 1
    s = _round_up(s, n_split)
    tk = _LANE * _cdiv(a, s)
    hw_pad = s * tk
    return tk, hw_pad, s, n_split


def _gram_kernel(feat_ref, mask_ref, g_ref, *, gram_norm):
    # feat_ref: (n_pad, TK) slice of the (zero-padded) features
    # mask_ref: (1, TK)     broadcast row of the spatial mask
    # g_ref:    (n_pad, n_pad) f32 output block, resident across the K axis
    k = pl.program_id(1)

    @pl.when(k == 0)
    def _init():
        g_ref[...] = jnp.zeros_like(g_ref)

    f = feat_ref[...] * mask_ref[...]  # VPU elementwise, broadcast over rows
    # f @ f^T: contract dim 1 of both operands directly on the MXU -- no
    # explicit transpose, no relayout temporary.  Accumulate into the output.
    g_ref[...] += lax.dot_general(
        f, f, dimension_numbers=(((1,), (1,)), ((), ())),
        preferred_element_type=jnp.float32)

    @pl.when(k == pl.num_programs(1) - 1)
    def _finalize():
        g_ref[...] *= gram_norm


def masked_gram(x, mask2d, feat_dtype=jnp.float32):
    """gram_matrix(x * mask): x (B,C,H,W), mask2d (H,W) -> (B*C, B*C) f32."""
    B, C, H, W = x.shape
    N, HW = B * C, H * W

    feat_bytes = jnp.dtype(feat_dtype).itemsize
    sublane = 8 if feat_bytes >= 4 else (16 if feat_bytes == 2 else 32)
    n_pad = _round_up(N, sublane)

    vmem_limit, n_cores = _tpu_budget()
    tk, hw_pad, s, n_split = _choose_tiling(HW, n_pad, vmem_limit,
                                            feat_bytes, n_cores)
    # TODO(synk): for very large B*C (n_pad >~ 2000 on v7x) the fully resident
    # (n_pad, n_pad) gram no longer fits VMEM; an (i, j)-tiled-output variant
    # with K innermost would be needed.

    feats = x.reshape(N, HW).astype(feat_dtype)        # free reshape
    if (n_pad, hw_pad) != (N, HW):                     # pad only when needed
        feats = jnp.pad(feats, ((0, n_pad - N), (0, hw_pad - HW)))
    mask_row = mask2d.reshape(1, HW).astype(feat_dtype)
    if hw_pad != HW:
        mask_row = jnp.pad(mask_row, ((0, 0), (0, hw_pad - HW)))

    steps_per_split = s // n_split
    kernel = functools.partial(_gram_kernel, gram_norm=1.0 / float(B * C * H * W))

    partials = pl.pallas_call(
        kernel,
        out_shape=jax.ShapeDtypeStruct((n_split, n_pad, n_pad), jnp.float32),
        grid=(n_split, steps_per_split),
        in_specs=[
            pl.BlockSpec((n_pad, tk),
                         lambda c, k: (0, c * steps_per_split + k)),
            pl.BlockSpec((1, tk),
                         lambda c, k: (0, c * steps_per_split + k)),
        ],
        out_specs=pl.BlockSpec((None, n_pad, n_pad), lambda c, k: (c, 0, 0)),
        compiler_params=pltpu.CompilerParams(
            dimension_semantics=("parallel", "arbitrary"),
            vmem_limit_bytes=vmem_limit,
        ),
    )(feats, mask_row)

    g = jnp.sum(partials, axis=0) if n_split > 1 else partials[0]
    return g[:N, :N]


def gram_target(target_feature, mask2d, feat_dtype=jnp.float32):
    """Mimics StyleLoss.__init__: target = gram_matrix(target_feature * mask)."""
    return masked_gram(target_feature, mask2d, feat_dtype)


def style_loss_forward(x, mask2d, target, feat_dtype=jnp.float32):
    """Mimics StyleLoss.forward: returns (input, loss, G)."""
    G = masked_gram(x, mask2d, feat_dtype)
    # O(N^2) MSE on the true (N, N) gram: done in the wrapper (per review) so
    # the kernel does not have to keep a resident double-buffered target.
    loss = jnp.mean((target.astype(jnp.float32) - G) ** 2)
    return x, loss, G


if __name__ == "__main__":
    # TODO(synk): mask_loader's PIL ToPILImage/Resize/CenterCrop preprocessing
    # has no Pallas equivalent; the mask is supplied directly at feature
    # resolution.
    key = jax.random.PRNGKey(0)
    k1, k2, k3, k4, k5 = jax.random.split(key, 5)

    def ref_gram(inp, m2d):
        b, c, h, w = inp.shape
        f = (inp * m2d[None, None]).reshape(b * c, h * w)
        return f @ f.T / (b * c * h * w)

    # --- aligned shapes (no padding path): B*C = 8, H*W = 256 ---------------
    B, C, H, W = 2, 4, 16, 16
    target_feature = jax.random.normal(k1, (B, C, H, W), jnp.float32)
    x = jax.random.normal(k2, (B, C, H, W), jnp.float32)
    mask2d = jax.random.uniform(k3, (H, W), jnp.float32)  # stand-in soft mask

    # __init__ : precompute the (detached) target gram matrix.
    target = jax.block_until_ready(gram_target(target_feature, mask2d))

    # forward(input)
    out, loss, G = style_loss_forward(x, mask2d, target)
    out, loss, G = jax.block_until_ready((out, loss, G))

    g_tgt_ref = ref_gram(target_feature, mask2d)
    g_ref = ref_gram(x, mask2d)
    loss_ref = jnp.mean((target - g_ref) ** 2)

    assert jnp.allclose(target, g_tgt_ref, rtol=1e-5, atol=1e-5)
    assert jnp.allclose(G, g_ref, rtol=1e-5, atol=1e-5)
    assert jnp.allclose(loss, loss_ref, rtol=1e-5, atol=1e-6)
    assert jnp.array_equal(out, x)  # forward returns input unchanged

    # --- ragged shapes (exercise the minimal-padding path): N=3, HW=225 -----
    B2, C2, H2, W2 = 1, 3, 15, 15
    x2 = jax.random.normal(k4, (B2, C2, H2, W2), jnp.float32)
    mask2 = jax.random.uniform(k5, (H2, W2), jnp.float32)
    G2 = jax.block_until_ready(masked_gram(x2, mask2))
    assert jnp.allclose(G2, ref_gram(x2, mask2), rtol=1e-5, atol=1e-5)

    print("KERNEL_OK")
</pallas_src>

<mosaic_0001>
module attributes {stable_mosaic.version = 11 : i64} {
  func.func @_gram_kernel(%arg0: i32, %arg1: i32, %arg2: memref<8x256xf32, #tpu.memory_space<vmem>>, %arg3: memref<1x256xf32, #tpu.memory_space<vmem>>, %arg4: memref<1x8x8xf32, #tpu.memory_space<vmem>>) attributes {dimension_semantics = [#tpu.dimension_semantics<parallel>, #tpu.dimension_semantics<arbitrary>], iteration_bounds = array<i64: 1, 1>, scalar_prefetch = 0 : i64, scratch_operands = 0 : i64, tpu.core_type = #tpu.core_type<tc>, window_params = [{transform_indices = @transform_0, window_bounds = array<i64: 8, 256>}, {transform_indices = @transform_1, window_bounds = array<i64: 1, 256>}, {transform_indices = @transform_2, window_bounds = array<i64: 1, 8, 8>}]} {
    %c0_i32 = arith.constant 0 : i32
    %0 = arith.cmpi eq, %arg1, %c0_i32 : i32
    %1 = arith.extui %0 : i1 to i32
    %c0_i32_0 = arith.constant 0 : i32
    %2 = arith.cmpi ne, %1, %c0_i32_0 : i32
    scf.if %2 {
      %cst_12 = arith.constant 0.000000e+00 : f32
      %17 = vector.broadcast %cst_12 : f32 to vector<8x8xf32>
      %c0_13 = arith.constant 0 : index
      %c0_14 = arith.constant 0 : index
      %c0_15 = arith.constant 0 : index
      %18 = vector.load %arg4[%c0_13, %c0_14, %c0_15] : memref<1x8x8xf32, #tpu.memory_space<vmem>>, vector<1x8x8xf32>
      %19 = vector.shape_cast %18 : vector<1x8x8xf32> to vector<8x8xf32>
      %20 = vector.shape_cast %17 : vector<8x8xf32> to vector<1x8x8xf32>
      tpu.vector_store %arg4[%c0_13, %c0_14, %c0_15], %20 {strides = array<i32>} : memref<1x8x8xf32, #tpu.memory_space<vmem>>, vector<1x8x8xf32>,
    } else {
    }
    %c0 = arith.constant 0 : index
    %c0_1 = arith.constant 0 : index
    %3 = vector.load %arg2[%c0, %c0_1] : memref<8x256xf32, #tpu.memory_space<vmem>>, vector<8x256xf32>
    %c0_2 = arith.constant 0 : index
    %c0_3 = arith.constant 0 : index
    %4 = vector.load %arg3[%c0_2, %c0_3] : memref<1x256xf32, #tpu.memory_space<vmem>>, vector<1x256xf32>
    %5 = vector.broadcast %4 : vector<1x256xf32> to vector<8x256xf32>
    %6 = arith.mulf %3, %5 : vector<8x256xf32>
    %c0_4 = arith.constant 0 : index
    %c0_5 = arith.constant 0 : index
    %c0_6 = arith.constant 0 : index
    %7 = vector.load %arg4[%c0_4, %c0_5, %c0_6] : memref<1x8x8xf32, #tpu.memory_space<vmem>>, vector<1x8x8xf32>
    %8 = vector.shape_cast %7 : vector<1x8x8xf32> to vector<8x8xf32>
    %cst = arith.constant dense<0.000000e+00> : vector<8x8xf32>
    %9 = tpu.matmul %6, %6, %cst {dimension_numbers = #tpu.dot_dimension_numbers<[1], [1], [0], [0], [0, 0, 1, 0], [], []>} : vector<8x256xf32>, vector<8x256xf32>, vector<8x8xf32> -> vector<8x8xf32>
    %10 = arith.addf %8, %9 : vector<8x8xf32>
    %c0_7 = arith.constant 0 : index
    %c0_8 = arith.constant 0 : index
    %c0_9 = arith.constant 0 : index
    %11 = vector.load %arg4[%c0_7, %c0_8, %c0_9] : memref<1x8x8xf32, #tpu.memory_space<vmem>>, vector<1x8x8xf32>
    %12 = vector.shape_cast %11 : vector<1x8x8xf32> to vector<8x8xf32>
    %13 = vector.shape_cast %10 : vector<8x8xf32> to vector<1x8x8xf32>
    tpu.vector_store %arg4[%c0_7, %c0_8, %c0_9], %13 {strides = array<i32>} : memref<1x8x8xf32, #tpu.memory_space<vmem>>, vector<1x8x8xf32>,
    %c0_i32_10 = arith.constant 0 : i32
    %14 = arith.cmpi eq, %arg1, %c0_i32_10 : i32
    %15 = arith.extui %14 : i1 to i32
    %c0_i32_11 = arith.constant 0 : i32
    %16 = arith.cmpi ne, %15, %c0_i32_11 : i32
    scf.if %16 {
      %c0_12 = arith.constant 0 : index
      %c0_13 = arith.constant 0 : index
      %c0_14 = arith.constant 0 : index
      %17 = vector.load %arg4[%c0_12, %c0_13, %c0_14] : memref<1x8x8xf32, #tpu.memory_space<vmem>>, vector<1x8x8xf32>
      %18 = vector.shape_cast %17 : vector<1x8x8xf32> to vector<8x8xf32>
      %cst_15 = arith.constant 4.8828125E-4 : f32
      %19 = vector.broadcast %cst_15 : f32 to vector<8x8xf32>
      %20 = arith.mulf %18, %19 : vector<8x8xf32>
      %c0_16 = arith.constant 0 : index
      %c0_17 = arith.constant 0 : index
      %c0_18 = arith.constant 0 : index
      %21 = vector.load %arg4[%c0_16, %c0_17, %c0_18] : memref<1x8x8xf32, #tpu.memory_space<vmem>>, vector<1x8x8xf32>
      %22 = vector.shape_cast %21 : vector<1x8x8xf32> to vector<8x8xf32>
      %23 = vector.shape_cast %20 : vector<8x8xf32> to vector<1x8x8xf32>
      tpu.vector_store %arg4[%c0_16, %c0_17, %c0_18], %23 {strides = array<i32>} : memref<1x8x8xf32, #tpu.memory_space<vmem>>, vector<1x8x8xf32>,
    } else {
    }
    return
  }
  func.func @transform_0(%arg0: i32, %arg1: i32) -> (i32, i32) {
    %c1_i32 = arith.constant 1 : i32
    %0 = arith.muli %arg0, %c1_i32 : i32
    %1 = arith.addi %0, %arg1 : i32
    %c0_i32 = arith.constant 0 : i32
    %c0_i32_0 = arith.constant 0 : i32
    return %c0_i32, %1 : i32, i32
  }
  func.func @transform_1(%arg0: i32, %arg1: i32) -> (i32, i32) {
    %c1_i32 = arith.constant 1 : i32
    %0 = arith.muli %arg0, %c1_i32 : i32
    %1 = arith.addi %0, %arg1 : i32
    %c0_i32 = arith.constant 0 : i32
    %c0_i32_0 = arith.constant 0 : i32
    return %c0_i32, %1 : i32, i32
  }
  func.func @transform_2(%arg0: i32, %arg1: i32) -> (i32, i32, i32) {
    %c0_i32 = arith.constant 0 : i32
    %c0_i32_0 = arith.constant 0 : i32
    %c0_i32_1 = arith.constant 0 : i32
    return %arg0, %c0_i32, %c0_i32_0 : i32, i32, i32
  }
}

</mosaic_0001>

<bundles_post_ra>
// kernel: tpu_custom_call.1
= control target key start
LH: loop header
LB: loop body
LE: loop exit
PB: predicated region body
PF: predicated region fallthrough
CT: control target
= control target key end

     0   :  { %7 = vsyncpa [#allocation3], 0  ;;  %s267_s0 = inlined_call_operand.hbm [shape: f32[8,256], index: 0, kind: input, shape index: {}]   ;;  %s268_s1 = inlined_call_operand.hbm [shape: f32[1,256], index: 1, kind: input, shape index: {}]   ;;  %s269_s2 = inlined_call_operand.hbm [shape: f32[1,8,8], index: 2, kind: output, shape index: {}]  }
   0x1   :  { %8 = vsyncpa [#allocation6], 0 }
   0x2   :  { %9 = vsyncpa [#allocation4], 0  ;;  %s236_s9 = smov [#allocation2]   ;;  %s237_s11 = smov [#allocation5]  }
   0x3   :  { %s20_s10 = sshll.u32 %s236_s9, 4  ;;  %s34_s12 = sshll.u32 %s237_s11, 4  ;;  %s21_s10 = int_to_ptr.vmem [resolvable:$true] %s20_s10  ;;  %s35_s12 = int_to_ptr.vmem [resolvable:$true] %s34_s12 }
   0x4   :  { %s178_s13 = scalar_lea.vmem %s21_s10, 256  ;;  %p183_p1 = scmp.lt.s32.totalorder %s21_s10, %s21_s10 }
   0x5   :  { %p179_p0 = scmp.ne.s32.totalorder %s21_s10, %s178_s13  ;;  %p184_p2 = scmp.lt.s32.totalorder %s178_s13, %s178_s13 }
   0x7   :  { %p185_p3 = por %p184_p2, %p183_p1 }
   0x9   :  { %p186_p4 = pnand %p185_p3, %p179_p0 }
   0xb   :  { %189 = shalt.err (!%p186_p4)
}
   0xc   :  { %23 = dma.hbm_to_vmem [thread:$0]  %s267_s0, 256, %s21_s10, [#allocation3]  }
   0xd   :  { %s198_s16 = scalar_lea.vmem %s35_s12, 32  ;;  %p203_p6 = scmp.lt.s32.totalorder %s35_s12, %s35_s12 }
   0xe   :  { %p199_p5 = scmp.ne.s32.totalorder %s35_s12, %s198_s16  ;;  %p204_p7 = scmp.lt.s32.totalorder %s198_s16, %s198_s16 }
  0x10   :  { %p205_p8 = por %p204_p7, %p203_p6 }
  0x12   :  { %p206_p9 = pnand %p205_p8, %p199_p5 }
  0x14   :  { %209 = shalt.err (!%p206_p9)
}
  0x15   :  { %37 = dma.hbm_to_vmem [thread:$0]  %s268_s1, 32, %s35_s12, [#allocation6]  }
  0x16   :  { %230 = dma.done.wait [#allocation3], 256  }
  0x17   :  { %231 = vsyncadd [#allocation3], 4294967040 }
  0x18   :  { %232 = dma.done.wait [#allocation6], 32  }
  0x19   :  { %233 = vsyncadd [#allocation6], 4294967264  ;;  %v58_v0 = vlaneseq  ;;  %vm52_vm0 = vcmask 64512   ;;  %v238_v1 = vmov 0.0   ;;  %v55_v5 = vld [vmem:[#allocation2 + $0x8] sm:$0xff]  ;;  %v54_v7 = vld [vmem:[#allocation2] sm:$0xff] }
  0x1a   :  { %53 = vst.msk [vmem:[#allocation7] sm:$0xff] %vm52_vm0, %v238_v1  ;;  %v56_v6 = vld [vmem:[#allocation5] sm:$0x3]  ;;  %s239_s0 = smov [#allocation7]  }
  0x1b   :  { %v59_v2 = vshrl.u32 %v58_v0, 7  ;;  %s156_s1 = sshll.u32 %s239_s0, 4  ;;  %s157_s1 = int_to_ptr.vmem [resolvable:$true] %s156_s1 }
  0x1c   :  { %s210_s19 = scalar_lea.vmem %s157_s1, 128  ;;  %p215_p11 = scmp.lt.s32.totalorder %s157_s1, %s157_s1 }
  0x1d   :  { %v64_v3 = vsub.s32 1, %v59_v2  ;;  %v60_v4 = vsub.s32 0, %v59_v2  ;;  %p211_p10 = scmp.ne.s32.totalorder %s157_s1, %s210_s19  ;;  %p216_p12 = scmp.lt.s32.totalorder %s210_s19, %s210_s19 }
  0x1f   :  { %v65_v8 = vrot.slane %v56_v6, %v64_v3  ;;  %v61_v9 = vrot.slane %v56_v6, %v60_v4  ;;  %p217_p13 = por %p216_p12, %p215_p11 }
  0x21   :  { %v69_v10 = vmul.f32 %v65_v8, %v55_v5  ;;  %v68_v11 = vmul.f32 %v61_v9, %v54_v7  ;;  %v70_v12 = vld [vmem:[#allocation7] sm:$0xff]  ;;  %p218_p0 = pnand %p217_p13, %p211_p10 }
  0x23   :  { %101 = vmatprep.subr.mxu0 %v69_v10  ;;  %135 = vmatprep.mubr.f32.mxu0 %v69_v10 }
  0x24   :  { %102 = vmatpush1.xpose.msra.mxu0 %v68_v11 }
  0x27   :  { %136 = vmatmul.mubr.f32.vlgmr.msra.gmra.mxu0 %v68_v11 }
  0xe7   :  { %v137_v13 = vpop.f32.mrf.mxu0 }
  0xe8   :  { %v141_v14 = vadd.f32 %v137_v13, %v70_v12 }
  0xe9   :  { %v139_v15 = vpop.f32.mrf.mxu0 }
  0xea   :  { %143 = vst.msk [vmem:[#allocation7] sm:$0xff] %vm52_vm0, %v141_v14 }
  0xf1   :  { %v147_v16 = vld [vmem:[#allocation7] sm:$0xff] }
  0xf2   :  { %v148_v17 = vmul.f32 0.00048828125, %v147_v16 }
  0xf4   :  { %149 = vst.msk [vmem:[#allocation7] sm:$0xff] %vm52_vm0, %v148_v17 }
  0xf5   :  { %221 = shalt.err (!%p218_p0)
}
  0xf6   :  { %159 = dma.vmem_to_hbm [thread:$0]  %s157_s1, 128, %s269_s2, [#allocation4]  }
  0xf7   :  { %234 = dma.done.wait [#allocation4], 128  }
  0xf8   :  { %235 = vsyncadd [#allocation4], 4294967168 }
  0xf9   :  { %163 = vsyncpa [#allocation3], 1 }
  0xfa   :  { %164 = vsyncpa [#allocation6], 1 }
  0xfb   :  { %165 = vsyncpa [#allocation4], 1 }

</bundles_post_ra>
